<compile_context>
chip_gen: v7x
topology: tpu7x:2x2x1
jax: 0.10.0
libtpu: 0.0.40
codegen_flags: <defaults>
</compile_context>

<pallas_src>
import math
from functools import lru_cache

import jax
import jax.numpy as jnp
import numpy as np
from jax.experimental import pallas as pl
from jax.experimental.pallas import tpu as pltpu


# ------------------------------ small helpers -------------------------------

def _hz_to_mel(f):
    return 2595.0 * math.log10(1.0 + f / 700.0)


def _mel_to_hz(m):
    return 700.0 * (10.0 ** (m / 2595.0) - 1.0)


def _round_up(x, m):
    return ((x + m - 1) // m) * m


def _cdiv(a, b):
    return (a + b - 1) // b


# ------------------------------ filter design --------------------------------

def make_lowpass_taps(cutoff_frac, zeros=8):
    """julius.lowpass_filter FIR taps (hann-windowed sinc, sum-normalised).

    Returns (taps float32[2*half + 1], half).
    """
    half = int(zeros / cutoff_frac / 2)
    k = 2 * half + 1
    t = np.arange(-half, half + 1, dtype=np.float64)
    # torch.hann_window(k, periodic=False)
    window = 0.5 - 0.5 * np.cos(2.0 * np.pi * np.arange(k) / max(k - 1, 1))
    x = 2.0 * cutoff_frac * t
    sinc = np.where(x == 0.0, 1.0, np.sin(np.pi * x) / (np.pi * x))
    filt = 2.0 * cutoff_frac * window * sinc
    filt = filt / filt.sum()
    return filt.astype(np.float32), half


def build_band_matrix(taps, lead_zeros, t_tile, n_chunks):
    """Banded Toeplitz W[tau + k, tau] = taps_shifted[k] (host-side numpy).

    taps_shifted = [zeros(lead_zeros), taps, zeros...] absorbs the bucketed
    left-pad shift.  Shape: (n_chunks * t_tile, t_tile), float32.
    """
    window = n_chunks * t_tile
    taps_shift = np.zeros(window, np.float32)
    taps_shift[lead_zeros:lead_zeros + taps.shape[0]] = taps
    d = np.arange(window)[:, None] - np.arange(t_tile)[None, :]
    w = np.where(d >= 0, taps_shift[np.clip(d, 0, window - 1)], 0.0)
    return w.astype(np.float32)


# -------------------------------- Pallas kernel ------------------------------

def _fir_band_matmul_kernel(x_ref, w_hi_ref, w_lo_ref, o_ref, acc_ref):
    # x_ref    : VMEM (r_tile, t_tile)  f32, padded-input chunk (r, t + j)
    # w_hi/lo  : VMEM (t_tile, t_tile)  bf16, band-matrix chunk j (hi/lo split)
    # o_ref    : VMEM (r_tile, t_tile)  f32, output block (r, t)
    # acc_ref  : VMEM (r_tile, t_tile)  f32 accumulator scratch
    j = pl.program_id(2)

    @pl.when(j == 0)
    def _init():
        acc_ref[...] = jnp.zeros_like(acc_ref)

    x = x_ref[...]
    x_hi = x.astype(jnp.bfloat16)
    x_lo = (x - x_hi.astype(jnp.float32)).astype(jnp.bfloat16)
    w_hi = w_hi_ref[...]
    w_lo = w_lo_ref[...]
    # Manual 3-pass bf16 decomposition (== lax.Precision.HIGH); the dropped
    # x_lo @ w_lo term is O(2^-18) relative, well inside the test tolerance.
    acc_ref[...] += (
        jnp.dot(x_hi, w_hi, preferred_element_type=jnp.float32)
        + jnp.dot(x_lo, w_hi, preferred_element_type=jnp.float32)
        + jnp.dot(x_hi, w_lo, preferred_element_type=jnp.float32)
    )

    @pl.when(j == pl.num_programs(2) - 1)
    def _store():
        o_ref[...] = acc_ref[...].astype(o_ref.dtype)


@lru_cache(maxsize=None)
def _make_fir_fn(R, T, r_tile, r_pad, t_tile, t_blocks, n_chunks, left_pad):
    """Build + jit the full forward pass for one static configuration bucket."""
    total_t = (t_blocks + n_chunks - 1) * t_tile
    grid = (r_pad // r_tile, t_blocks, n_chunks)

    # Per-step VMEM footprint: double-buffered in/out blocks + accumulator.
    block_bytes = (
        2 * r_tile * t_tile * 4            # x  (f32, double-buffered)
        + 2 * 2 * t_tile * t_tile * 2      # w_hi / w_lo (bf16, double-buffered)
        + 2 * r_tile * t_tile * 4          # out (f32, double-buffered)
        + r_tile * t_tile * 4              # accumulator scratch
    )
    vmem_limit = min(max(block_bytes * 2 + (8 << 20), 16 << 20), 64 << 20)

    call = pl.pallas_call(
        _fir_band_matmul_kernel,
        out_shape=jax.ShapeDtypeStruct((r_pad, t_blocks * t_tile), jnp.float32),
        grid=grid,
        in_specs=[
            # Padded input: one (r_tile, t_tile) chunk per contraction step.
            pl.BlockSpec((r_tile, t_tile), lambda r, t, j: (r, t + j)),
            # Band matrix (hi / lo halves): chunk j, shared by all (r, t).
            pl.BlockSpec((t_tile, t_tile), lambda r, t, j: (j, 0)),
            pl.BlockSpec((t_tile, t_tile), lambda r, t, j: (j, 0)),
        ],
        out_specs=pl.BlockSpec((r_tile, t_tile), lambda r, t, j: (r, t)),
        scratch_shapes=[pltpu.VMEM((r_tile, t_tile), jnp.float32)],
        compiler_params=pltpu.CompilerParams(
            dimension_semantics=("parallel", "parallel", "arbitrary"),
            vmem_limit_bytes=int(vmem_limit),
        ),
    )

    def fn(x2d, w_f32):
        x = x2d.astype(jnp.float32)
        # Rows: pad to r_pad (extra rows are sliced away again).  Time: the
        # left `left_pad` columns and at least `half` columns on the right
        # must be replicate ('edge') padded to match julius; columns further
        # right only meet zero taps or feed discarded outputs, so a single
        # edge pad covers everything.
        # TODO(synk): fold the replicate padding into the kernel (pl.when on
        # the first/last time block) to drop this extra pass for long clips.
        x = jnp.pad(x, ((0, r_pad - R), (left_pad, total_t - T - left_pad)),
                    mode="edge")
        w_hi = w_f32.astype(jnp.bfloat16)
        w_lo = (w_f32 - w_hi.astype(jnp.float32)).astype(jnp.bfloat16)
        out = call(x, w_hi, w_lo)
        return out[:R, :T]

    return jax.jit(fn)


# -------------------------------- host wrapper -------------------------------

def _choose_r_tile(R):
    """Largest row tile (multiple of 8, <=128) with bounded dead-row waste."""
    base = _round_up(max(R, 1), 8)
    for cand in (128, 64, 32, 16, 8):
        if cand > base:
            continue
        waste = _round_up(R, cand) - R
        if waste <= max(R // 4, 7):
            return cand
    return min(base, 128)


def lowpass_filter_pallas(waveform, cutoff_frac):
    """Apply a julius-style low-pass FIR along the last (time) axis."""
    B, C, T = waveform.shape
    R = B * C

    taps, half = make_lowpass_taps(float(cutoff_frac))

    # Time tile: 128 keeps structural-zero band waste low for short filters
    # (high cutoffs); 256 amortises the halo re-read for long ones.
    t_tile = 128 if half <= 64 else 256
    t_tile = min(t_tile, max(128, _round_up(T, 128)))
    t_blocks = _cdiv(T, t_tile)

    # Bucket the replicate left pad to 64 samples so the jitted wrapper (and
    # the pallas_call inside) compiles once per bucket, not once per random
    # cutoff; the shift is absorbed into the band matrix as leading zeros.
    left_pad = _round_up(max(half, 1), 64)
    k_shift = half + left_pad + 1               # shifted (zero-prefixed) tap count
    n_chunks = 1 + _cdiv(k_shift - 1, t_tile)   # window chunks from the true K
    # TODO(synk): for very small K (high cutoffs) a VPU shift-accumulate path
    # would beat the banded matmul; not implemented here.

    r_tile = _choose_r_tile(R)
    r_pad = _round_up(R, r_tile)
    # TODO(synk): with tiny B*C the MXU M-dim is underfed (8/256 rows); batching
    # several augmentation calls into one kernel launch is the intended fix.

    w = build_band_matrix(taps, left_pad - half, t_tile, n_chunks)

    fn = _make_fir_fn(R, T, r_tile, r_pad, t_tile, t_blocks, n_chunks, left_pad)
    out = fn(waveform.reshape(R, T), jnp.asarray(w))
    return out.reshape(B, C, T).astype(waveform.dtype)


# -------------------------------- module wrapper ------------------------------

class LowPassFilter:
    def __init__(self, min_cutoff_freq=150, max_cutoff_freq=7500, p=0.5,
                 sample_rate=16000):
        if min_cutoff_freq > max_cutoff_freq:
            raise ValueError("min_cutoff_freq must not be greater than max_cutoff_freq")
        self.min_cutoff_freq = min_cutoff_freq
        self.max_cutoff_freq = max_cutoff_freq
        self.p = p
        self.sample_rate = sample_rate
        self.transform_parameters = {}

    def randomize_parameters(self, key):
        lo = _hz_to_mel(self.min_cutoff_freq)
        hi = _hz_to_mel(self.max_cutoff_freq)
        # Host read is unavoidable: the FIR length (→ static kernel config)
        # depends on the drawn cutoff.  Configs are bucketed, so this costs a
        # small device→host transfer per forward, not a recompile.
        u = float(jax.random.uniform(key))
        self.transform_parameters["cutoff_freq"] = _mel_to_hz(lo + u * (hi - lo))

    def forward(self, waveform, key):
        # TODO(synk): the python-level `random.random() <= p` gate is made
        # deterministic here (the augmentation is always applied) so the
        # kernel path is exercised.
        self.randomize_parameters(key)
        cutoff_frac = self.transform_parameters["cutoff_freq"] / self.sample_rate
        return lowpass_filter_pallas(waveform, cutoff_frac)


# ------------------------------------ main ------------------------------------

if __name__ == "__main__":
    key = jax.random.PRNGKey(0)
    k_wave, k_cutoff = jax.random.split(key)

    B, C, T = 2, 4, 1024
    waveform = jax.random.normal(k_wave, (B, C, T), dtype=jnp.float32)

    module = LowPassFilter(min_cutoff_freq=150, max_cutoff_freq=7500,
                           p=0.5, sample_rate=16000)
    out = module.forward(waveform, k_cutoff)
    out = jax.block_until_ready(out)
    assert out.shape == (B, C, T) and out.dtype == jnp.float32

    # Independent float64 reference (same math as julius.lowpass_filter).
    cutoff_frac = module.transform_parameters["cutoff_freq"] / module.sample_rate
    taps, half = make_lowpass_taps(cutoff_frac)
    taps64 = taps.astype(np.float64)
    x_np = np.asarray(waveform).reshape(B * C, T).astype(np.float64)
    x_pad_np = np.pad(x_np, ((0, 0), (half, half)), mode="edge")
    ref = np.zeros((B * C, T), np.float64)
    for kk in range(taps64.shape[0]):
        ref += taps64[kk] * x_pad_np[:, kk:kk + T]
    # Tolerance sized for the 3-pass bf16 (Precision.HIGH-equivalent) matmul:
    # per-product relative error ~2^-16, accumulated in f32.
    np.testing.assert_allclose(np.asarray(out).reshape(B * C, T), ref,
                               rtol=2e-4, atol=5e-5)

    print("KERNEL_OK")
</pallas_src>

<mosaic_0001>
module attributes {stable_mosaic.version = 11 : i64} {
  func.func @_fir_band_matmul_kernel(%arg0: i32, %arg1: i32, %arg2: i32, %arg3: memref<8x256xf32, #tpu.memory_space<vmem>>, %arg4: memref<256x256xbf16, #tpu.memory_space<vmem>>, %arg5: memref<256x256xbf16, #tpu.memory_space<vmem>>, %arg6: memref<8x256xf32, #tpu.memory_space<vmem>>, %arg7: memref<8x256xf32, #tpu.memory_space<vmem>>) attributes {dimension_semantics = [#tpu.dimension_semantics<parallel>, #tpu.dimension_semantics<parallel>, #tpu.dimension_semantics<arbitrary>], iteration_bounds = array<i64: 1, 4, 5>, scalar_prefetch = 0 : i64, scratch_operands = 1 : i64, tpu.core_type = #tpu.core_type<tc>, window_params = [{transform_indices = @transform_0, window_bounds = array<i64: 8, 256>}, {transform_indices = @transform_1, window_bounds = array<i64: 256, 256>}, {transform_indices = @transform_2, window_bounds = array<i64: 256, 256>}, {transform_indices = @transform_3, window_bounds = array<i64: 8, 256>}]} {
    %c0_i32 = arith.constant 0 : i32
    %0 = arith.cmpi eq, %arg2, %c0_i32 : i32
    %1 = arith.extui %0 : i1 to i32
    %c0_i32_0 = arith.constant 0 : i32
    %2 = arith.cmpi ne, %1, %c0_i32_0 : i32
    scf.if %2 {
      %cst_13 = arith.constant 0.000000e+00 : f32
      %21 = vector.broadcast %cst_13 : f32 to vector<8x256xf32>
      %c0_14 = arith.constant 0 : index
      %c0_15 = arith.constant 0 : index
      %22 = vector.load %arg7[%c0_14, %c0_15] : memref<8x256xf32, #tpu.memory_space<vmem>>, vector<8x256xf32>
      tpu.vector_store %arg7[%c0_14, %c0_15], %21 {strides = array<i32>} : memref<8x256xf32, #tpu.memory_space<vmem>>, vector<8x256xf32>,
    } else {
    }
    %c0 = arith.constant 0 : index
    %c0_1 = arith.constant 0 : index
    %3 = vector.load %arg3[%c0, %c0_1] : memref<8x256xf32, #tpu.memory_space<vmem>>, vector<8x256xf32>
    %4 = arith.truncf %3 : vector<8x256xf32> to vector<8x256xbf16>
    %5 = arith.extf %4 : vector<8x256xbf16> to vector<8x256xf32>
    %6 = arith.subf %3, %5 : vector<8x256xf32>
    %7 = arith.truncf %6 : vector<8x256xf32> to vector<8x256xbf16>
    %c0_2 = arith.constant 0 : index
    %c0_3 = arith.constant 0 : index
    %8 = vector.load %arg4[%c0_2, %c0_3] : memref<256x256xbf16, #tpu.memory_space<vmem>>, vector<256x256xbf16>
    %c0_4 = arith.constant 0 : index
    %c0_5 = arith.constant 0 : index
    %9 = vector.load %arg5[%c0_4, %c0_5] : memref<256x256xbf16, #tpu.memory_space<vmem>>, vector<256x256xbf16>
    %c0_6 = arith.constant 0 : index
    %c0_7 = arith.constant 0 : index
    %10 = vector.load %arg7[%c0_6, %c0_7] : memref<8x256xf32, #tpu.memory_space<vmem>>, vector<8x256xf32>
    %cst = arith.constant dense<0.000000e+00> : vector<8x256xf32>
    %11 = tpu.matmul %4, %8, %cst {dimension_numbers = #tpu.dot_dimension_numbers<[1], [0], [0], [1], [0, 0, 1, 1], [], []>} : vector<8x256xbf16>, vector<256x256xbf16>, vector<8x256xf32> -> vector<8x256xf32>
    %cst_8 = arith.constant dense<0.000000e+00> : vector<8x256xf32>
    %12 = tpu.matmul %7, %8, %cst_8 {dimension_numbers = #tpu.dot_dimension_numbers<[1], [0], [0], [1], [0, 0, 1, 1], [], []>} : vector<8x256xbf16>, vector<256x256xbf16>, vector<8x256xf32> -> vector<8x256xf32>
    %13 = arith.addf %11, %12 : vector<8x256xf32>
    %cst_9 = arith.constant dense<0.000000e+00> : vector<8x256xf32>
    %14 = tpu.matmul %4, %9, %cst_9 {dimension_numbers = #tpu.dot_dimension_numbers<[1], [0], [0], [1], [0, 0, 1, 1], [], []>} : vector<8x256xbf16>, vector<256x256xbf16>, vector<8x256xf32> -> vector<8x256xf32>
    %15 = arith.addf %13, %14 : vector<8x256xf32>
    %16 = arith.addf %10, %15 : vector<8x256xf32>
    %c0_10 = arith.constant 0 : index
    %c0_11 = arith.constant 0 : index
    %17 = vector.load %arg7[%c0_10, %c0_11] : memref<8x256xf32, #tpu.memory_space<vmem>>, vector<8x256xf32>
    tpu.vector_store %arg7[%c0_10, %c0_11], %16 {strides = array<i32>} : memref<8x256xf32, #tpu.memory_space<vmem>>, vector<8x256xf32>,
    %c4_i32 = arith.constant 4 : i32
    %18 = arith.cmpi eq, %arg2, %c4_i32 : i32
    %19 = arith.extui %18 : i1 to i32
    %c0_i32_12 = arith.constant 0 : i32
    %20 = arith.cmpi ne, %19, %c0_i32_12 : i32
    scf.if %20 {
      %c0_13 = arith.constant 0 : index
      %c0_14 = arith.constant 0 : index
      %21 = vector.load %arg7[%c0_13, %c0_14] : memref<8x256xf32, #tpu.memory_space<vmem>>, vector<8x256xf32>
      %c0_15 = arith.constant 0 : index
      %c0_16 = arith.constant 0 : index
      %22 = vector.load %arg6[%c0_15, %c0_16] : memref<8x256xf32, #tpu.memory_space<vmem>>, vector<8x256xf32>
      tpu.vector_store %arg6[%c0_15, %c0_16], %21 {strides = array<i32>} : memref<8x256xf32, #tpu.memory_space<vmem>>, vector<8x256xf32>,
    } else {
    }
    return
  }
  func.func @transform_0(%arg0: i32, %arg1: i32, %arg2: i32) -> (i32, i32) {
    %0 = arith.addi %arg1, %arg2 : i32
    %c0_i32 = arith.constant 0 : i32
    return %arg0, %0 : i32, i32
  }
  func.func @transform_1(%arg0: i32, %arg1: i32, %arg2: i32) -> (i32, i32) {
    %c0_i32 = arith.constant 0 : i32
    %c0_i32_0 = arith.constant 0 : i32
    return %arg2, %c0_i32 : i32, i32
  }
  func.func @transform_2(%arg0: i32, %arg1: i32, %arg2: i32) -> (i32, i32) {
    %c0_i32 = arith.constant 0 : i32
    %c0_i32_0 = arith.constant 0 : i32
    return %arg2, %c0_i32 : i32, i32
  }
  func.func @transform_3(%arg0: i32, %arg1: i32, %arg2: i32) -> (i32, i32) {
    %c0_i32 = arith.constant 0 : i32
    return %arg0, %arg1 : i32, i32
  }
}

</mosaic_0001>

<bundles_post_ra>
// kernel: fn.1
= control target key start
LH: loop header
LB: loop body
LE: loop exit
PB: predicated region body
PF: predicated region fallthrough
CT: control target
= control target key end

     0   :  { %8 = vsyncpa [#allocation4], 0  ;;  %s1526_s0 = inlined_call_operand.vmem [shape: f32[8,2048], index: 0, kind: input, shape index: {}]   ;;  %s1527_s1 = inlined_call_operand.vmem [shape: bf16[1280,256], index: 1, kind: input, shape index: {}]   ;;  %s1528_s2 = inlined_call_operand.vmem [shape: bf16[1280,256], index: 2, kind: input, shape index: {}]   ;;  %s1529_s3 = inlined_call_operand.hbm [shape: f32[8,1024], index: 3, kind: output, shape index: {}]  }
   0x1   :  { %10 = vsyncpa [#allocation4 + $0x1], 0  ;;  %s1300_s12 = smov 0   ;;  %s1302_s13 = smov 0  }
   0x2   :  { %s1304_s14 = smov 0   ;;  %s1306_s15 = smov 0  }
   0x3   :  { %s1308_s16 = smov 0   ;;  %s1310_s17 = smov 0  }
   0x4   :  { %s1312_s18 = smov 0   ;;  %s1314_s19 = smov 0  }
   0x5 LB: > { %s926_s20 = sadd.s32 4294967295, %s1276_s19   ;;  %s927_s21 = sadd.s32 4294967294, %s1276_s19   ;;  %s1276_s19 = sphi %s1314_s19, %s16_s19   ;;  %s1272_s18 = sphi %s1312_s18, %s1543_s18   ;;  %s1268_s17 = sphi %s1310_s17, %s1542_s17   ;;  %s1264_s16 = sphi %s1308_s16, %s1541_s16   ;;  %s1260_s15 = sphi %s1306_s15, %s1540_s15   ;;  %s1256_s14 = sphi %s1304_s14, %s1539_s14   ;;  %s1252_s13 = sphi %s1302_s13, %s1538_s13   ;;  %s1248_s12 = sphi %s1300_s12, %s1537_s12  }
   0x6   : > { %s28_s22 = sadd.s32 1, %s1268_s17  ;;  %s31_s23 = sadd.s32 1, %s1272_s18 }
   0x7   : > { %p29_p0 = scmp.ge.s32.totalorder %s28_s22, 5  ;;  %p136_p1 = scmp.ne.s32.totalorder %s1256_s14, %s1252_s13 }
   0x8   : > { %p137_p2 = scmp.eq.s32.totalorder %s926_s20, 19  ;;  %p142_p4 = scmp.ne.s32.totalorder %s1252_s13, %s1248_s12 }
   0x9   : > { %s1545_s22 = smov (%p29_p0, %s28_s22), 0  ;;  %s1547_s23 = smov (!%p29_p0, %s31_s23), %s1272_s18 }
   0xa   : > { %p1349_p3 = por %p137_p2, %p136_p1  ;;  %p33_p5 = scmp.ge.s32.totalorder %s1547_s23, 4 }
   0xb   : > { %p143_p6 = scmp.eq.s32.totalorder %s927_s21, 19  ;;  %p930_p7 = scmp.ge.s32.totalorder %s1276_s19, 1 }
   0xc   : > { %p196_p8 = scmp.lt.s32.totalorder %s1276_s19, 21  ;;  %s1549_s23 = smov (%p33_p5, %s1547_s23), 0 }
   0xd   : > { %1533 = sst [smem:[#allocation6_spill]] %s1549_s23  ;;  %p1359_p9 = por %p143_p6, %p142_p4 }
   0xe   : > { %p197_p10 = pnand %p930_p7, %p196_p8  ;;  %s122_s26 = ssub.s32 %s1272_s18, %s1549_s23 }
   0xf   : > { %s126_s27 = sadd.s32 1, %s1256_s14  ;;  %p124_p11 = scmp.eq.s32.totalorder %s122_s26, 0 }
  0x10   : > { %200 = sbr.rel (%p197_p10) target bundleno = 413 (0x19d), region = 32  ;;  %s1530_s29 = sand.u32 (!%p197_p10), 1, %s1252_s13  }
  0x11   : > { %s1367_s28 = scalar_select %p124_p11, %s1256_s14, %s126_s27  }
  0x12   : > { %s237_s30 = sadd.s32 (!%p197_p10), %s1260_s15, %s1264_s16  ;;  %s931_s4 = sshll.u32 (!%p197_p10), %s1530_s29, 4 }
  0x13   : > { %s932_s5 = sshll.u32 (!%p197_p10), %s237_s30, 1  ;;  %s934_s6 = sshll.u32 (!%p197_p10), %s1260_s15, 5 }
  0x14   : > { %p241_p12 = scmp.lt.s32.totalorder (!%p197_p10), %s932_s5, 15  ;;  %p250_p13 = scmp.lt.s32.totalorder (!%p197_p10), %s934_s6, 159 }
  0x15   : > { %s1390_s23 = scalar_lea.vmem (!%p197_p10), [#allocation3], %s931_s4  ;;  %p940_p0 = scmp.ne.s32.totalorder (!%p197_p10), %s1260_s15, 0 }
  0x17   : > { %s1551_s5 = smov (!%p241_p12, %s932_s5), 15  ;;  %s1553_s6 = smov (!%p250_p13, %s934_s6), 159 }
  0x18   : > { %s933_s7 = sshll.u32 %s1551_s5, 3  ;;  %s1011_s11 = sshll.u32 %s1553_s6, 3  ;;  %v1278_v0 = vmov (!%p940_p0), 0.0  }
  0x19   : > { %s1378_s10 = scalar_lea.vmem %s1526_s0, %s933_s7  ;;  %s1383_s26 = scalar_lea.vmem %s1527_s1, %s1011_s11  ;;  %268 = vst [vmem:[#allocation2] sm:$0xff] (!%p940_p0), %v1278_v0  ;;  %269 = vst [vmem:[#allocation2 + $0x8] sm:$0xff] (!%p940_p0), %v1278_v0 }
  0x1a   : > { %s1388_s30 = scalar_lea.vmem %s1528_s2, %s1011_s11  ;;  %267 = sbr.rel (%p940_p0) target bundleno = 33 (0x21), region = 36 }
  0x21 PF: > { %v1086_v1 = vld [vmem:[%s1383_s26 + $0x4] ss:$8 sps:$4 sm:$0xff]   ;;  %v1088_v2 = vld [vmem:[%s1383_s26] ss:$8 sps:$4 sm:$0xff]   ;;  %v1089_v3 = vld [vmem:[%s1383_s26 + $0x14] ss:$8 sps:$4 sm:$0xff]  }
  0x22   : > { %506 = vmatprep.subr.bf16.mxu0 %v1086_v1  ;;  %547 = vmatprep.subr.bf16.mxu1 %v1086_v1  ;;  %v1091_v4 = vld [vmem:[%s1383_s26 + $0x10] ss:$8 sps:$4 sm:$0xff]   ;;  %v1092_v5 = vld [vmem:[%s1383_s26 + $0x24] ss:$8 sps:$4 sm:$0xff]   ;;  %v1094_v6 = vld [vmem:[%s1383_s26 + $0x20] ss:$8 sps:$4 sm:$0xff]  }
  0x23   : > { %507 = vmatpush1.bf16.msra.mxu0 %v1088_v2  ;;  %548 = vmatpush1.bf16.msra.mxu1 %v1088_v2  ;;  %v1095_v7 = vld [vmem:[%s1383_s26 + $0x34] ss:$8 sps:$4 sm:$0xff]   ;;  %v1097_v8 = vld [vmem:[%s1383_s26 + $0x30] ss:$8 sps:$4 sm:$0xff]   ;;  %v1098_v9 = vld [vmem:[%s1383_s26 + $0x44] ss:$8 sps:$4 sm:$0xff]  }
  0x24   : > { %508 = vmatprep.subr.bf16.mxu0 %v1089_v3  ;;  %549 = vmatprep.subr.bf16.mxu1 %v1089_v3  ;;  %v1100_v10 = vld [vmem:[%s1383_s26 + $0x40] ss:$8 sps:$4 sm:$0xff]   ;;  %v1101_v11 = vld [vmem:[%s1383_s26 + $0x54] ss:$8 sps:$4 sm:$0xff]   ;;  %v1103_v12 = vld [vmem:[%s1383_s26 + $0x50] ss:$8 sps:$4 sm:$0xff]  }
  0x25   : > { %v1104_v13 = vld [vmem:[%s1383_s26 + $0x64] ss:$8 sps:$4 sm:$0xff]   ;;  %v1106_v16 = vld [vmem:[%s1383_s26 + $0x60] ss:$8 sps:$4 sm:$0xff]   ;;  %v1107_v17 = vld [vmem:[%s1383_s26 + $0x74] ss:$8 sps:$4 sm:$0xff]  }
  0x26   : > { %v271_v14 = vld [vmem:[%s1378_s10 + $0x8] sm:$0xff]  ;;  %v1109_v20 = vld [vmem:[%s1383_s26 + $0x70] ss:$8 sps:$4 sm:$0xff]   ;;  %v1113_v24 = vld [vmem:[%s1383_s26 + $0x94] ss:$8 sps:$4 sm:$0xff]   ;;  %p1005_p1 = scmp.ne.s32.totalorder %s1260_s15, 4 }
  0x27   : > { %509 = vmatpush1.bf16.msra.mxu0 %v1091_v4  ;;  %550 = vmatpush1.bf16.msra.mxu1 %v1091_v4  ;;  %v1407_v15 = vpack.c.bf16 %v271_v14, %v271_v14  ;;  %v1110_v21 = vld [vmem:[%s1383_s26 + $0x84] ss:$8 sps:$4 sm:$0xff]   ;;  %v1112_v23 = vld [vmem:[%s1383_s26 + $0x80] ss:$8 sps:$4 sm:$0xff]   ;;  %v1115_v25 = vld [vmem:[%s1383_s26 + $0x90] ss:$8 sps:$4 sm:$0xff]  }
  0x28   : > { %510 = vmatprep.subr.bf16.mxu0 %v1092_v5  ;;  %551 = vmatprep.subr.bf16.mxu1 %v1092_v5  ;;  %v1116_v26 = vld [vmem:[%s1383_s26 + $0xa4] ss:$8 sps:$4 sm:$0xff]   ;;  %v1118_v27 = vld [vmem:[%s1383_s26 + $0xa0] ss:$8 sps:$4 sm:$0xff]   ;;  %v1119_v28 = vld [vmem:[%s1383_s26 + $0xb4] ss:$8 sps:$4 sm:$0xff]  }
  0x29   : > { %v275_v18 = vunpack.c.l.bf16 %v1407_v15  ;;  %579 = vmatprep.mubr.bf16.mxu1 %v1407_v15  ;;  %v1121_v29 = vld [vmem:[%s1383_s26 + $0xb0] ss:$8 sps:$4 sm:$0xff]   ;;  %v1122_v30 = vld [vmem:[%s1383_s26 + $0xc4] ss:$8 sps:$4 sm:$0xff]   ;;  %v1124_v31 = vld [vmem:[%s1383_s26 + $0xc0] ss:$8 sps:$4 sm:$0xff]  }
  0x2a   : > { %v270_v32 = vld [vmem:[%s1378_s10] sm:$0xff]  ;;  %v1125_v33 = vld [vmem:[%s1383_s26 + $0xd4] ss:$8 sps:$4 sm:$0xff]   ;;  %v1127_v35 = vld [vmem:[%s1383_s26 + $0xd0] ss:$8 sps:$4 sm:$0xff]  }
  0x2b   : > { %511 = vmatpush1.bf16.msra.mxu0 %v1094_v6  ;;  %552 = vmatpush1.bf16.msra.mxu1 %v1094_v6  ;;  %v277_v19 = vsub.f32 %v271_v14, %v275_v18  ;;  %v1426_v34 = vpack.c.bf16 %v270_v32, %v270_v32  ;;  %v1128_v36 = vld [vmem:[%s1383_s26 + $0xe4] ss:$8 sps:$4 sm:$0xff]   ;;  %v1130_v38 = vld [vmem:[%s1383_s26 + $0xe0] ss:$8 sps:$4 sm:$0xff]   ;;  %v1131_v39 = vld [vmem:[%s1383_s26 + $0xf4] ss:$8 sps:$4 sm:$0xff]  }
  0x2c   : > { %512 = vmatprep.subr.bf16.mxu0 %v1095_v7  ;;  %553 = vmatprep.subr.bf16.mxu1 %v1095_v7  ;;  %v1133_v41 = vld [vmem:[%s1383_s26 + $0xf0] ss:$8 sps:$4 sm:$0xff]   ;;  %v1136_v42 = vld [vmem:[%s1388_s30 + $0x4] ss:$8 sps:$4 sm:$0xff]   ;;  %v1134_v44 = vld [vmem:[%s1388_s30] ss:$8 sps:$4 sm:$0xff]  }
  0x2d   : > { %v279_v22 = vpack.c.bf16 %v277_v19, %v277_v19  ;;  %v274_v37 = vunpack.c.l.bf16 %v1426_v34  ;;  %v1139_v45 = vld [vmem:[%s1388_s30 + $0x14] ss:$8 sps:$4 sm:$0xff]   ;;  %v1137_v46 = vld [vmem:[%s1388_s30 + $0x10] ss:$8 sps:$4 sm:$0xff]   ;;  %v1142_v47 = vld [vmem:[%s1388_s30 + $0x24] ss:$8 sps:$4 sm:$0xff]  }
  0x2e   : > { %v1140_v48 = vld [vmem:[%s1388_s30 + $0x20] ss:$8 sps:$4 sm:$0xff]   ;;  %v1145_v49 = vld [vmem:[%s1388_s30 + $0x34] ss:$8 sps:$4 sm:$0xff]   ;;  %v1143_v50 = vld [vmem:[%s1388_s30 + $0x30] ss:$8 sps:$4 sm:$0xff]  }
  0x2f   : > { %513 = vmatpush1.bf16.msra.mxu0 %v1097_v8  ;;  %554 = vmatpush1.bf16.msra.mxu1 %v1097_v8  ;;  %v276_v40 = vsub.f32 %v270_v32, %v274_v37  ;;  %v1148_v51 = vld [vmem:[%s1388_s30 + $0x44] ss:$8 sps:$4 sm:$0xff]   ;;  %v1146_v52 = vld [vmem:[%s1388_s30 + $0x40] ss:$8 sps:$4 sm:$0xff]   ;;  %v1151_v53 = vld [vmem:[%s1388_s30 + $0x54] ss:$8 sps:$4 sm:$0xff]  }
  0x30   : > { %514 = vmatprep.subr.bf16.mxu0 %v1098_v9  ;;  %555 = vmatprep.subr.bf16.mxu1 %v1098_v9  ;;  %v1149_v54 = vld [vmem:[%s1388_s30 + $0x50] ss:$8 sps:$4 sm:$0xff]   ;;  %v1154_v55 = vld [vmem:[%s1388_s30 + $0x64] ss:$8 sps:$4 sm:$0xff]   ;;  %v1152_v56 = vld [vmem:[%s1388_s30 + $0x60] ss:$8 sps:$4 sm:$0xff]  }
  0x31   : > { %538 = vmatprep.mubr.bf16.mxu0 %v279_v22  ;;  %v278_v43 = vpack.c.bf16 %v276_v40, %v276_v40  ;;  %v1157_v57 = vld [vmem:[%s1388_s30 + $0x74] ss:$8 sps:$4 sm:$0xff]   ;;  %v1155_v58 = vld [vmem:[%s1388_s30 + $0x70] ss:$8 sps:$4 sm:$0xff]   ;;  %v1160_v59 = vld [vmem:[%s1388_s30 + $0x84] ss:$8 sps:$4 sm:$0xff]  }
  0x32   : > { %v1158_v60 = vld [vmem:[%s1388_s30 + $0x80] ss:$8 sps:$4 sm:$0xff]   ;;  %v1163_v61 = vld [vmem:[%s1388_s30 + $0x94] ss:$8 sps:$4 sm:$0xff]   ;;  %v1161_v62 = vld [vmem:[%s1388_s30 + $0x90] ss:$8 sps:$4 sm:$0xff]  }
  0x33   : > { %515 = vmatpush1.bf16.msra.mxu0 %v1100_v10  ;;  %556 = vmatpush1.bf16.msra.mxu1 %v1100_v10  ;;  %v1166_v63 = vld [vmem:[%s1388_s30 + $0xa4] ss:$8 sps:$4 sm:$0xff]   ;;  %v1164_v0 = vld [vmem:[%s1388_s30 + $0xa0] ss:$8 sps:$4 sm:$0xff]   ;;  %v1169_v1 = vld [vmem:[%s1388_s30 + $0xb4] ss:$8 sps:$4 sm:$0xff]  }
  0x34   : > { %516 = vmatprep.subr.bf16.mxu0 %v1101_v11  ;;  %557 = vmatprep.subr.bf16.mxu1 %v1101_v11  ;;  %v1167_v2 = vld [vmem:[%s1388_s30 + $0xb0] ss:$8 sps:$4 sm:$0xff]   ;;  %v1172_v3 = vld [vmem:[%s1388_s30 + $0xc4] ss:$8 sps:$4 sm:$0xff]   ;;  %v1170_v4 = vld [vmem:[%s1388_s30 + $0xc0] ss:$8 sps:$4 sm:$0xff]  }
  0x35   : > { %v1175_v5 = vld [vmem:[%s1388_s30 + $0xd4] ss:$8 sps:$4 sm:$0xff]   ;;  %v1173_v6 = vld [vmem:[%s1388_s30 + $0xd0] ss:$8 sps:$4 sm:$0xff]   ;;  %v1178_v7 = vld [vmem:[%s1388_s30 + $0xe4] ss:$8 sps:$4 sm:$0xff]  }
  0x36   : > { %v1176_v8 = vld [vmem:[%s1388_s30 + $0xe0] ss:$8 sps:$4 sm:$0xff]   ;;  %v1181_v9 = vld [vmem:[%s1388_s30 + $0xf4] ss:$8 sps:$4 sm:$0xff]   ;;  %v1179_v10 = vld [vmem:[%s1388_s30 + $0xf0] ss:$8 sps:$4 sm:$0xff]  }
  0x37   : > { %517 = vmatpush1.bf16.msra.mxu0 %v1103_v12  ;;  %558 = vmatpush1.bf16.msra.mxu1 %v1103_v12 }
  0x38   : > { %518 = vmatprep.subr.bf16.mxu0 %v1104_v13  ;;  %559 = vmatprep.subr.bf16.mxu1 %v1104_v13 }
  0x3b   : > { %519 = vmatpush1.bf16.msra.mxu0 %v1106_v16  ;;  %560 = vmatpush1.bf16.msra.mxu1 %v1106_v16 }
  0x3c   : > { %520 = vmatprep.subr.bf16.mxu0 %v1107_v17  ;;  %561 = vmatprep.subr.bf16.mxu1 %v1107_v17 }
  0x3f   : > { %521 = vmatpush1.bf16.msra.mxu0 %v1109_v20  ;;  %562 = vmatpush1.bf16.msra.mxu1 %v1109_v20 }
  0x40   : > { %522 = vmatprep.subr.bf16.mxu0 %v1110_v21  ;;  %563 = vmatprep.subr.bf16.mxu1 %v1110_v21  ;;  %v344_v21 = vld [vmem:[#allocation2] sm:$0xff] }
  0x43   : > { %523 = vmatpush1.bf16.msra.mxu0 %v1112_v23  ;;  %564 = vmatpush1.bf16.msra.mxu1 %v1112_v23 }
  0x44   : > { %524 = vmatprep.subr.bf16.mxu0 %v1113_v24  ;;  %565 = vmatprep.subr.bf16.mxu1 %v1113_v24  ;;  %v345_v24 = vld [vmem:[#allocation2 + $0x8] sm:$0xff] }
  0x47   : > { %525 = vmatpush1.bf16.msra.mxu0 %v1115_v25  ;;  %566 = vmatpush1.bf16.msra.mxu1 %v1115_v25 }
  0x48   : > { %526 = vmatprep.subr.bf16.mxu0 %v1116_v26  ;;  %567 = vmatprep.subr.bf16.mxu1 %v1116_v26 }
  0x4b   : > { %527 = vmatpush1.bf16.msra.mxu0 %v1118_v27  ;;  %568 = vmatpush1.bf16.msra.mxu1 %v1118_v27 }
  0x4c   : > { %528 = vmatprep.subr.bf16.mxu0 %v1119_v28  ;;  %569 = vmatprep.subr.bf16.mxu1 %v1119_v28 }
  0x4f   : > { %529 = vmatpush1.bf16.msra.mxu0 %v1121_v29  ;;  %570 = vmatpush1.bf16.msra.mxu1 %v1121_v29 }
  0x50   : > { %530 = vmatprep.subr.bf16.mxu0 %v1122_v30  ;;  %571 = vmatprep.subr.bf16.mxu1 %v1122_v30 }
  0x53   : > { %531 = vmatpush1.bf16.msra.mxu0 %v1124_v31  ;;  %572 = vmatpush1.bf16.msra.mxu1 %v1124_v31 }
  0x54   : > { %532 = vmatprep.subr.bf16.mxu0 %v1125_v33  ;;  %573 = vmatprep.subr.bf16.mxu1 %v1125_v33 }
  0x57   : > { %533 = vmatpush1.bf16.msra.mxu0 %v1127_v35  ;;  %574 = vmatpush1.bf16.msra.mxu1 %v1127_v35 }
  0x58   : > { %534 = vmatprep.subr.bf16.mxu0 %v1128_v36  ;;  %575 = vmatprep.subr.bf16.mxu1 %v1128_v36 }
  0x5b   : > { %535 = vmatpush1.bf16.msra.mxu0 %v1130_v38  ;;  %576 = vmatpush1.bf16.msra.mxu1 %v1130_v38 }
  0x5c   : > { %536 = vmatprep.subr.bf16.mxu0 %v1131_v39  ;;  %577 = vmatprep.subr.bf16.mxu1 %v1131_v39 }
  0x5f   : > { %537 = vmatpush1.bf16.msra.mxu0 %v1133_v41  ;;  %578 = vmatpush1.bf16.msra.mxu1 %v1133_v41 }
  0x60   : > { %748 = vmatprep.subr.bf16.mxu0 %v1136_v42 }
  0x62   : > { %539 = vmatmul.mubr.bf16.vlgmr.msra.gmra.mrb[0].mxu0 %v278_v43  ;;  %580 = vmatmul.mubr.bf16.vlgmr.msra.gmra.mrb[0].mxu1 %v1426_v34 }
  0x63   : > { %749 = vmatpush1.bf16.msra.mxu0 %v1134_v44  ;;  %780 = vmatprep.mubr.bf16.mxu0 %v1407_v15 }
  0x64   : > { %750 = vmatprep.subr.bf16.mxu0 %v1139_v45 }
  0x67   : > { %751 = vmatpush1.bf16.msra.mxu0 %v1137_v46 }
  0x68   : > { %752 = vmatprep.subr.bf16.mxu0 %v1142_v47 }
  0x6b   : > { %753 = vmatpush1.bf16.msra.mxu0 %v1140_v48 }
  0x6c   : > { %754 = vmatprep.subr.bf16.mxu0 %v1145_v49 }
  0x6f   : > { %755 = vmatpush1.bf16.msra.mxu0 %v1143_v50 }
  0x70   : > { %756 = vmatprep.subr.bf16.mxu0 %v1148_v51 }
  0x73   : > { %757 = vmatpush1.bf16.msra.mxu0 %v1146_v52 }
  0x74   : > { %758 = vmatprep.subr.bf16.mxu0 %v1151_v53 }
  0x77   : > { %759 = vmatpush1.bf16.msra.mxu0 %v1149_v54 }
  0x78   : > { %760 = vmatprep.subr.bf16.mxu0 %v1154_v55 }
  0x7b   : > { %761 = vmatpush1.bf16.msra.mxu0 %v1152_v56 }
  0x7c   : > { %762 = vmatprep.subr.bf16.mxu0 %v1157_v57 }
  0x7f   : > { %763 = vmatpush1.bf16.msra.mxu0 %v1155_v58 }
  0x80   : > { %764 = vmatprep.subr.bf16.mxu0 %v1160_v59 }
  0x83   : > { %765 = vmatpush1.bf16.msra.mxu0 %v1158_v60 }
  0x84   : > { %766 = vmatprep.subr.bf16.mxu0 %v1163_v61 }
  0x87   : > { %767 = vmatpush1.bf16.msra.mxu0 %v1161_v62 }
  0x88   : > { %768 = vmatprep.subr.bf16.mxu0 %v1166_v63 }
  0x8b   : > { %769 = vmatpush1.bf16.msra.mxu0 %v1164_v0 }
  0x8c   : > { %770 = vmatprep.subr.bf16.mxu0 %v1169_v1 }
  0x8f   : > { %771 = vmatpush1.bf16.msra.mxu0 %v1167_v2 }
  0x90   : > { %772 = vmatprep.subr.bf16.mxu0 %v1172_v3 }
  0x93   : > { %773 = vmatpush1.bf16.msra.mxu0 %v1170_v4 }
  0x94   : > { %774 = vmatprep.subr.bf16.mxu0 %v1175_v5 }
  0x97   : > { %775 = vmatpush1.bf16.msra.mxu0 %v1173_v6 }
  0x98   : > { %776 = vmatprep.subr.bf16.mxu0 %v1178_v7 }
  0x9b   : > { %777 = vmatpush1.bf16.msra.mxu0 %v1176_v8 }
  0x9c   : > { %778 = vmatprep.subr.bf16.mxu0 %v1181_v9 }
  0x9f   : > { %779 = vmatpush1.bf16.msra.mxu0 %v1179_v10 }
  0xa2   : > { %781 = vmatmul.mubr.bf16.vlgmr.msra.gmra.mrb[4].mxu0 %v1426_v34 }
 0x135   : > { %v540_v11 = vpop.f32.mrb[0].mxu0  ;;  %v581_v12 = vpop.f32.mrb[0].mxu1 }
 0x136   : > { %v582_v13 = vadd.f32 %v581_v12, %v540_v11  ;;  %v542_v14 = vpop.f32.mrb[1].mxu0  ;;  %v583_v15 = vpop.f32.mrb[1].mxu1 }
 0x137   : > { %v584_v16 = vadd.f32 %v583_v15, %v542_v14  ;;  %v544_v17 = vpop.f32.mrb[2].mxu0  ;;  %v585_v18 = vpop.f32.mrb[2].mxu1 }
 0x138   : > { %v545_v19 = vpop.f32.mrb[3].mxu0  ;;  %v586_v20 = vpop.f32.mrb[3].mxu1 }
 0x175   : > { %v782_v22 = vpop.f32.mrb[4].mxu0  ;;  %798 = sbr.rel (%p1005_p1) target bundleno = 388 (0x184), region = 40 }
 0x176   : > { %v789_v23 = vadd.f32 %v782_v22, %v582_v13  ;;  %v784_v25 = vpop.f32.mrb[5].mxu0 }
 0x177   : > { %v790_v26 = vadd.f32 %v784_v25, %v584_v16  ;;  %v786_v27 = vpop.f32.mrb[6].mxu0 }
 0x178   : > { %v791_v28 = vadd.f32 %v789_v23, %v344_v21  ;;  %v787_v29 = vpop.f32.mrb[7].mxu0 }
 0x179   : > { %v792_v30 = vadd.f32 %v790_v26, %v345_v24 }
 0x17a   : > { %793 = vst [vmem:[#allocation2] sm:$0xff] %v791_v28 }
 0x17b   : > { %794 = vst [vmem:[#allocation2 + $0x8] sm:$0xff] %v792_v30 }
 0x181   : > { %v799_v31 = vld [vmem:[#allocation2] sm:$0xff] }
 0x182   : > { %v800_v32 = vld [vmem:[#allocation2 + $0x8] sm:$0xff]  ;;  %801 = vst [vmem:[%s1390_s23] sm:$0xff] %v799_v31 }
 0x183   : > { %802 = vst [vmem:[%s1390_s23 + $0x8] sm:$0xff] %v800_v32 }
 0x184 PF: > { %s1013_s29 = sshll.u32 %s1264_s16, 8  ;;  %s820_s7 = sshll.u32 %s1390_s23, 4  ;;  %s821_s7 = int_to_ptr.vmem [resolvable:$true] %s820_s7 }
 0x185   : > { %s1476_s6 = scalar_lea.hbm %s1529_s3, %s1013_s29  ;;  %s1535_s15 = sand.u32 1, %s1252_s13  }
 0x186   : > { %s804_s8 = scalar_lea.sflag [#allocation4], %s1535_s15  ;;  %s1182_s9 = scalar_lea.vmem %s821_s7, 256 }
 0x187   : > { %p1183_p2 = scmp.ne.s32.totalorder %s821_s7, %s1182_s9  ;;  %s1279_s10 = smov [#allocation3]  }
 0x188   : > { %s1186_s11 = sshll.u32 %s1279_s10, 4  ;;  %s1187_s11 = int_to_ptr.vmem [resolvable:$false] %s1186_s11 }
 0x189   : > { %p1184_p4 = pnand %p1183_p2, %p1349_p3  ;;  %s1188_s20 = scalar_lea.vmem %s1187_s11, 512 }
 0x18a   : > { %p1189_p6 = scmp.lt.s32.totalorder %s821_s7, %s1187_s11  ;;  %p1190_p7 = scmp.lt.s32.totalorder %s1188_s20, %s1182_s9 }
 0x18b   : > { %p1185_p5 = pneg %p1184_p4 }
 0x18c   : > { %p1191_p8 = por %p1190_p7, %p1189_p6 }
 0x18e   : > { %p1192_p10 = pnand %p1191_p8, %p1185_p5 }
 0x190   : > { %1195 = shalt.err (!%p1192_p10)
}
 0x191   : > { %s1196_s16 = scalar_lea.hbm %s1476_s6, 256  ;;  %s1200_s26 = scalar_lea.hbm %s1529_s3, 1024 }
 0x192   : > { %p1197_p11 = scmp.ne.s32.totalorder %s1476_s6, %s1196_s16  ;;  %p1201_p0 = scmp.lt.u32.totalorder %s1476_s6, %s1529_s3 }
 0x193   : > { %p1202_p1 = scmp.lt.u32.totalorder %s1200_s26, %s1196_s16  ;;  %p1204_p4 = scmp.lt.u32.totalorder %s1196_s16, %s1476_s6 }
 0x194   : > { %p1198_p12 = pnand %p1197_p11, %p1349_p3 }
 0x195   : > { %p1203_p2 = por %p1202_p1, %p1201_p0 }
 0x196   : > { %p1199_p13 = pneg %p1198_p12 }
 0x197   : > { %p1205_p5 = por %p1204_p4, %p1203_p2 }
 0x199   : > { %p1206_p6 = pnand %p1205_p5, %p1199_p13 }
 0x19b   : > { %1209 = shalt.err (!%p1206_p6)
}
 0x19c   : > { %1014 = dma.vmem_to_hbm [thread:$0]  (%p1349_p3), %s821_s7, 256, %s1476_s6, %s804_s8  }
 0x19d PF: > { %p1020_p7 = scmp.ge.s32.totalorder %s1276_s19, 2  ;;  %s832_s29 = sand.u32 1, %s1248_s12  }
 0x19e   : > { %s833_s4 = scalar_lea.sflag [#allocation4], %s832_s29 }
 0x19f   : > { %p1017_p8 = pnand %p1020_p7, %p1359_p9 }
 0x1a1   : > { %1243 = dma.done.wait (!%p1017_p8), %s833_s4, 256  }
 0x1a2   : > { %1245 = vsyncadd (!%p1017_p8), %s833_s4, 4294967040  ;;  %s16_s19 = sadd.s32 1, %s1276_s19   ;;  %s1536_s24 = sld [smem:[#allocation6_spill]] }
 0x1a3   : > { %p13_p10 = scmp.ge.s32.totalorder %s16_s19, 22   ;;  %s1537_s12 = smov %s1252_s13 }
 0x1a4   : > { %s1538_s13 = smov %s1256_s14  ;;  %s1539_s14 = smov %s1367_s28 }
 0x1a5   : > { %s1540_s15 = smov %s1268_s17  ;;  %s1541_s16 = smov %s1272_s18 }
 0x1a6   : > { %s1542_s17 = smov %s1545_s22  ;;  %15 = sbr.rel (!%p13_p10) target bundleno = 5 (0x5), region = 81 }
 0x1a8   : > { %s1543_s18 = smov %s1536_s24 }
 0x1ad   :  { %838 = vsyncpa [#allocation4], 1 }
 0x1ae   :  { %840 = vsyncpa [#allocation4 + $0x1], 1 }

</bundles_post_ra>
